<compile_context>
chip_gen: v5e
topology: v5e:2x2
jax: 0.10.0
libtpu: 0.0.40
codegen_flags: <defaults>
</compile_context>

<pallas_src>
import jax
import jax.numpy as jnp
from jax import lax
from jax.experimental import pallas as pl
from jax.experimental.pallas import tpu as pltpu

EPS = 1e-12  # matches torch.nn.functional.normalize default eps


# --------------------------------------------------------------------------
# Kernel
# --------------------------------------------------------------------------
def distmult_kernel(h_ref, r_ref, t_ref, n_ref, out_ref):
    # Blocks are [tile_b, D]: batch on sublanes, embedding dim on lanes.
    # Compute in f32 (v5e VPU/EUP have no bf16 path); the upcast is the only
    # per-element cost added by bf16 storage.
    h = h_ref[...].astype(jnp.float32)
    r = r_ref[...].astype(jnp.float32)
    t = t_ref[...].astype(jnp.float32)
    n = n_ref[...].astype(jnp.float32)

    def inv_norm(x):
        # 1 / max(||x||_2, eps) == rsqrt(max(sum(x^2), eps^2)): a single EUP
        # rsqrt instead of sqrt + max + reciprocal.  Row-wise ([tile_b, 1])
        # work only, negligible next to the [tile_b, D] elementwise ops.
        sumsq = jnp.sum(x * x, axis=-1, keepdims=True)
        return lax.rsqrt(jnp.maximum(sumsq, EPS * EPS))

    inv_h = inv_norm(h)
    inv_t = inv_norm(t)
    inv_n = inv_norm(n)

    # Factored shared products; F.normalize is folded into per-row
    # 1/max(||x||, eps) scales (mathematically identical to normalize-then-mul).
    rt = r * t            # used by pos_head, pos_tail, neg_head
    hrt = h * rt          # used by pos_head, pos_tail
    hrn = (h * r) * n     # used by neg_tail
    nrt = n * rt          # used by neg_head

    inv_ht = inv_h * inv_t
    # calc_score_head(h, r, t) = -sum_d(h_n * r * t_n)
    pos1 = -jnp.sum(hrt, axis=-1, keepdims=True) * inv_ht
    # calc_score_tail(h, r, t) = -|| h_n * (r * t_n) ||_2
    pos2 = -jnp.sqrt(jnp.sum(hrt * hrt, axis=-1, keepdims=True)) * inv_ht
    # calc_score_head(n, r, t)
    neg1 = -jnp.sum(nrt, axis=-1, keepdims=True) * (inv_n * inv_t)
    # calc_score_tail(h, r, n)
    neg2 = -jnp.sqrt(jnp.sum(hrn * hrn, axis=-1, keepdims=True)) * (inv_h * inv_n)

    # One assembled [tile_b, 4] store (columns: pos_head, pos_tail, neg_head,
    # neg_tail) instead of four single-column masked stores.
    out_ref[...] = jnp.concatenate([pos1, pos2, neg1, neg2], axis=-1)


# --------------------------------------------------------------------------
# Device-aware sizing helpers
# --------------------------------------------------------------------------
def _device_kind():
    try:
        return jax.devices()[0].device_kind.lower()
    except Exception:
        return ""


def _is_v7x():
    kind = _device_kind()
    return ("v7" in kind) or ("7x" in kind)


def _vmem_capacity_bytes():
    try:
        return int(pltpu.get_tpu_info().vmem_capacity_bytes)
    except Exception:
        return 64 * 1024 * 1024   # conservative: v7x per-TensorCore VMEM


def _dimension_semantics():
    # Only CORE_PARALLEL actually splits grid steps across the two v7x
    # TensorCores (measured: "parallel" vs "arbitrary" is a near no-op).
    core_par = getattr(pltpu, "CORE_PARALLEL", None)
    if core_par is not None and _is_v7x():
        return (core_par,)
    return ("parallel",)


def _auto_tile_b(D, itemsize):
    # HBM-bound kernel: per-step DMA must be big enough to amortize the
    # ~0.35 us/grid-step pipeline overhead; faster HBM (v7x) needs bigger steps.
    target_step_bytes = (16 << 20) if _is_v7x() else (4 << 20)
    hbm_bytes_per_row = 4 * D * itemsize                       # 4 input slabs
    d_pad = pl.cdiv(D, 128) * 128                              # VMEM lane padding
    vmem_bytes_per_row = (4 * 2 * d_pad * itemsize             # dbl-buffered inputs
                          + 2 * 128 * 4)                       # dbl-buffered f32 out
    vmem_budget = _vmem_capacity_bytes() // 3                  # headroom for scratch
    tile_b = min(target_step_bytes // hbm_bytes_per_row,
                 vmem_budget // vmem_bytes_per_row)
    tile_b = max(32, int(tile_b) // 32 * 32)                   # sublane/pack friendly
    return tile_b


# --------------------------------------------------------------------------
# Pallas wrapper
# --------------------------------------------------------------------------
def distmult_scores(h, r, t, n, *, tile_b=None):
    """h, r, t, n: gathered [B, D] embedding slabs (any float dtype).

    Returns (pos_score, neg_score), each of shape [2B]:
      pos_score = concat(score_head(h,r,t), score_tail(h,r,t))
      neg_score = concat(score_head(n,r,t), score_tail(h,r,n))
    """
    B, D = h.shape
    itemsize = jnp.dtype(h.dtype).itemsize

    if tile_b is None:
        tile_b = _auto_tile_b(D, itemsize)
    tile_b = int(min(tile_b, B))        # single full-batch block for small B
    n_tiles = pl.cdiv(B, tile_b)
    # No jnp.pad: a ragged last block is a Pallas-masked boundary block.  Its
    # garbage rows only produce garbage in *their own* (discarded) output rows
    # because every reduction here is per-row; OOB output writes are masked.

    d_pad = pl.cdiv(D, 128) * 128
    footprint = 4 * 2 * tile_b * d_pad * itemsize + 2 * tile_b * 128 * 4
    cap = _vmem_capacity_bytes()
    vmem_limit = int(min(cap * 3 // 4, max(32 << 20, footprint + (8 << 20))))
    vmem_limit = max(vmem_limit, footprint + (2 << 20))

    emb_spec = pl.BlockSpec((tile_b, D), lambda i: (i, 0))
    out_spec = pl.BlockSpec((tile_b, 4), lambda i: (i, 0))

    scores = pl.pallas_call(
        distmult_kernel,
        out_shape=jax.ShapeDtypeStruct((B, 4), jnp.float32),
        grid_spec=pltpu.PrefetchScalarGridSpec(
            num_scalar_prefetch=0,
            grid=(n_tiles,),
            in_specs=[emb_spec, emb_spec, emb_spec, emb_spec],
            out_specs=out_spec,
        ),
        compiler_params=pltpu.CompilerParams(
            dimension_semantics=_dimension_semantics(),
            vmem_limit_bytes=vmem_limit,
            # Hint: let XLA fuse the producing gather into the pallas operands
            # instead of materializing the gathered slabs separately in HBM.
            allow_input_fusion=[True, True, True, True],
        ),
    )(h, r, t, n)

    pos_score = jnp.concatenate([scores[:, 0], scores[:, 1]], axis=-1)
    neg_score = jnp.concatenate([scores[:, 2], scores[:, 3]], axis=-1)
    return pos_score, neg_score


# --------------------------------------------------------------------------
# Model glue
# --------------------------------------------------------------------------
def xavier_uniform(key, shape):
    # torch xavier_uniform_ on a 2-D weight: bound = sqrt(6 / (fan_in + fan_out))
    fan_out, fan_in = shape
    bound = (6.0 / (fan_in + fan_out)) ** 0.5
    return jax.random.uniform(key, shape, jnp.float32, -bound, bound)


@jax.jit
def _distmult_forward(ent_emb, rel_emb, batch_head, batch_rel, batch_tail,
                      batch_negative):
    # Row gather stays in XLA glue (here each row is only D*itemsize = 64 B, so
    # a per-row DMA gather inside the kernel would be descriptor-bound); with
    # allow_input_fusion XLA may fuse it straight into the pallas operands.
    # TODO(synk): for D*itemsize >= ~512 B, fuse the gather into the kernel via
    # scalar-prefetched index arrays + make_async_copy from pl.ANY tables.
    h = ent_emb[batch_head]
    r = rel_emb[batch_rel]
    t = ent_emb[batch_tail]
    n = ent_emb[batch_negative]
    return distmult_scores(h, r, t, n)


class DistMultJAX:
    def __init__(self, key, ent_tot, rel_tot, dim, dtype=jnp.bfloat16):
        k1, k2 = jax.random.split(key)
        # bf16 storage halves HBM traffic for this bandwidth-bound kernel; all
        # math runs in f32 after the in-kernel upcast.
        self.ent_embeddings = xavier_uniform(k1, (ent_tot, dim)).astype(dtype)
        self.rel_embeddings = xavier_uniform(k2, (rel_tot, dim)).astype(dtype)

    def __call__(self, batch_head, batch_rel, batch_tail, batch_negative):
        return _distmult_forward(self.ent_embeddings, self.rel_embeddings,
                                 batch_head, batch_rel, batch_tail,
                                 batch_negative)


# --------------------------------------------------------------------------
# Pure-JAX reference (mirrors the PyTorch forward, from the same parameters)
# --------------------------------------------------------------------------
def _reference(model, bh, br, bt, bn):
    h = model.ent_embeddings[bh].astype(jnp.float32)
    r = model.rel_embeddings[br].astype(jnp.float32)
    t = model.ent_embeddings[bt].astype(jnp.float32)
    n = model.ent_embeddings[bn].astype(jnp.float32)

    def norm(x):
        nrm = jnp.sqrt(jnp.sum(x * x, axis=-1, keepdims=True))
        return x / jnp.maximum(nrm, EPS)

    def head(h_, r_, t_):
        return -jnp.sum(norm(h_) * r_ * norm(t_), axis=-1)

    def tail(h_, r_, t_):
        p = norm(h_) * (r_ * norm(t_))
        return -jnp.sqrt(jnp.sum(p * p, axis=-1))

    pos = jnp.concatenate([head(h, r, t), tail(h, r, t)], -1)
    neg = jnp.concatenate([head(n, r, t), tail(h, r, n)], -1)
    return pos, neg


if __name__ == "__main__":
    key = jax.random.PRNGKey(0)
    k_model, k_h, k_r, k_t, k_n = jax.random.split(key, 5)

    ent_tot, rel_tot, dim, batch = 50, 12, 32, 8
    model = DistMultJAX(k_model, ent_tot, rel_tot, dim)

    batch_head = jax.random.randint(k_h, (batch,), 0, ent_tot)
    batch_rel = jax.random.randint(k_r, (batch,), 0, rel_tot)
    batch_tail = jax.random.randint(k_t, (batch,), 0, ent_tot)
    batch_negative = jax.random.randint(k_n, (batch,), 0, ent_tot)

    pos_score, neg_score = model(batch_head, batch_rel, batch_tail,
                                 batch_negative)
    jax.block_until_ready((pos_score, neg_score))

    ref_pos, ref_neg = _reference(model, batch_head, batch_rel, batch_tail,
                                  batch_negative)
    assert pos_score.shape == (2 * batch,) and neg_score.shape == (2 * batch,)
    # Kernel and reference start from identical bf16 parameters and compute in
    # f32; differences are only f32 rounding (rsqrt + normalization folding).
    assert jnp.allclose(pos_score, ref_pos, atol=1e-4, rtol=1e-4)
    assert jnp.allclose(neg_score, ref_neg, atol=1e-4, rtol=1e-4)

    print("KERNEL_OK")
</pallas_src>

<mosaic_0001>
module attributes {stable_mosaic.version = 11 : i64} {
  func.func @distmult_kernel(%arg0: i32, %arg1: memref<8x32xbf16, #tpu.memory_space<vmem>>, %arg2: memref<8x32xbf16, #tpu.memory_space<vmem>>, %arg3: memref<8x32xbf16, #tpu.memory_space<vmem>>, %arg4: memref<8x32xbf16, #tpu.memory_space<vmem>>, %arg5: memref<8x4xf32, #tpu.memory_space<vmem>>) attributes {dimension_semantics = [#tpu.dimension_semantics<parallel>], iteration_bounds = array<i64: 1>, scalar_prefetch = 0 : i64, scratch_operands = 0 : i64, tpu.core_type = #tpu.core_type<tc>, window_params = [{transform_indices = @transform_0, window_bounds = array<i64: 8, 32>}, {transform_indices = @transform_1, window_bounds = array<i64: 8, 32>}, {transform_indices = @transform_2, window_bounds = array<i64: 8, 32>}, {transform_indices = @transform_3, window_bounds = array<i64: 8, 32>}, {transform_indices = @transform_4, window_bounds = array<i64: 8, 4>}]} {
    %c0 = arith.constant 0 : index
    %c0_0 = arith.constant 0 : index
    %0 = vector.load %arg1[%c0, %c0_0] : memref<8x32xbf16, #tpu.memory_space<vmem>>, vector<8x32xbf16>
    %1 = arith.extf %0 : vector<8x32xbf16> to vector<8x32xf32>
    %c0_1 = arith.constant 0 : index
    %c0_2 = arith.constant 0 : index
    %2 = vector.load %arg2[%c0_1, %c0_2] : memref<8x32xbf16, #tpu.memory_space<vmem>>, vector<8x32xbf16>
    %3 = arith.extf %2 : vector<8x32xbf16> to vector<8x32xf32>
    %c0_3 = arith.constant 0 : index
    %c0_4 = arith.constant 0 : index
    %4 = vector.load %arg3[%c0_3, %c0_4] : memref<8x32xbf16, #tpu.memory_space<vmem>>, vector<8x32xbf16>
    %5 = arith.extf %4 : vector<8x32xbf16> to vector<8x32xf32>
    %c0_5 = arith.constant 0 : index
    %c0_6 = arith.constant 0 : index
    %6 = vector.load %arg4[%c0_5, %c0_6] : memref<8x32xbf16, #tpu.memory_space<vmem>>, vector<8x32xbf16>
    %7 = arith.extf %6 : vector<8x32xbf16> to vector<8x32xf32>
    %8 = arith.mulf %1, %1 : vector<8x32xf32>
    %cst = arith.constant dense<0.000000e+00> : vector<8xf32>
    %9 = vector.multi_reduction <add>, %8, %cst [1] : vector<8x32xf32> to vector<8xf32>
    %10 = vector.shape_cast %9 : vector<8xf32> to vector<8x1xf32>
    %cst_7 = arith.constant 1.000000e-24 : f32
    %11 = vector.broadcast %cst_7 : f32 to vector<8x1xf32>
    %12 = arith.maximumf %10, %11 : vector<8x1xf32>
    %13 = math.rsqrt %12 : vector<8x1xf32>
    %14 = arith.mulf %5, %5 : vector<8x32xf32>
    %cst_8 = arith.constant dense<0.000000e+00> : vector<8xf32>
    %15 = vector.multi_reduction <add>, %14, %cst_8 [1] : vector<8x32xf32> to vector<8xf32>
    %16 = vector.shape_cast %15 : vector<8xf32> to vector<8x1xf32>
    %cst_9 = arith.constant 1.000000e-24 : f32
    %17 = vector.broadcast %cst_9 : f32 to vector<8x1xf32>
    %18 = arith.maximumf %16, %17 : vector<8x1xf32>
    %19 = math.rsqrt %18 : vector<8x1xf32>
    %20 = arith.mulf %7, %7 : vector<8x32xf32>
    %cst_10 = arith.constant dense<0.000000e+00> : vector<8xf32>
    %21 = vector.multi_reduction <add>, %20, %cst_10 [1] : vector<8x32xf32> to vector<8xf32>
    %22 = vector.shape_cast %21 : vector<8xf32> to vector<8x1xf32>
    %cst_11 = arith.constant 1.000000e-24 : f32
    %23 = vector.broadcast %cst_11 : f32 to vector<8x1xf32>
    %24 = arith.maximumf %22, %23 : vector<8x1xf32>
    %25 = math.rsqrt %24 : vector<8x1xf32>
    %26 = arith.mulf %3, %5 : vector<8x32xf32>
    %27 = arith.mulf %1, %26 : vector<8x32xf32>
    %28 = arith.mulf %1, %3 : vector<8x32xf32>
    %29 = arith.mulf %28, %7 : vector<8x32xf32>
    %30 = arith.mulf %7, %26 : vector<8x32xf32>
    %31 = arith.mulf %13, %19 : vector<8x1xf32>
    %cst_12 = arith.constant dense<0.000000e+00> : vector<8xf32>
    %32 = vector.multi_reduction <add>, %27, %cst_12 [1] : vector<8x32xf32> to vector<8xf32>
    %33 = vector.shape_cast %32 : vector<8xf32> to vector<8x1xf32>
    %cst_13 = arith.constant 0.000000e+00 : f32
    %34 = vector.broadcast %cst_13 : f32 to vector<8x1xf32>
    %35 = arith.subf %34, %33 : vector<8x1xf32>
    %36 = arith.mulf %35, %31 : vector<8x1xf32>
    %37 = arith.mulf %27, %27 : vector<8x32xf32>
    %cst_14 = arith.constant dense<0.000000e+00> : vector<8xf32>
    %38 = vector.multi_reduction <add>, %37, %cst_14 [1] : vector<8x32xf32> to vector<8xf32>
    %39 = vector.shape_cast %38 : vector<8xf32> to vector<8x1xf32>
    %40 = math.sqrt %39 : vector<8x1xf32>
    %cst_15 = arith.constant 0.000000e+00 : f32
    %41 = vector.broadcast %cst_15 : f32 to vector<8x1xf32>
    %42 = arith.subf %41, %40 : vector<8x1xf32>
    %43 = arith.mulf %42, %31 : vector<8x1xf32>
    %cst_16 = arith.constant dense<0.000000e+00> : vector<8xf32>
    %44 = vector.multi_reduction <add>, %30, %cst_16 [1] : vector<8x32xf32> to vector<8xf32>
    %45 = vector.shape_cast %44 : vector<8xf32> to vector<8x1xf32>
    %cst_17 = arith.constant 0.000000e+00 : f32
    %46 = vector.broadcast %cst_17 : f32 to vector<8x1xf32>
    %47 = arith.subf %46, %45 : vector<8x1xf32>
    %48 = arith.mulf %25, %19 : vector<8x1xf32>
    %49 = arith.mulf %47, %48 : vector<8x1xf32>
    %50 = arith.mulf %29, %29 : vector<8x32xf32>
    %cst_18 = arith.constant dense<0.000000e+00> : vector<8xf32>
    %51 = vector.multi_reduction <add>, %50, %cst_18 [1] : vector<8x32xf32> to vector<8xf32>
    %52 = vector.shape_cast %51 : vector<8xf32> to vector<8x1xf32>
    %53 = math.sqrt %52 : vector<8x1xf32>
    %cst_19 = arith.constant 0.000000e+00 : f32
    %54 = vector.broadcast %cst_19 : f32 to vector<8x1xf32>
    %55 = arith.subf %54, %53 : vector<8x1xf32>
    %56 = arith.mulf %13, %25 : vector<8x1xf32>
    %57 = arith.mulf %55, %56 : vector<8x1xf32>
    %58 = tpu.concatenate %36, %43, %49, %57 in 1 : vector<8x1xf32>, vector<8x1xf32>, vector<8x1xf32>, vector<8x1xf32> -> vector<8x4xf32>
    %c0_20 = arith.constant 0 : index
    %c0_21 = arith.constant 0 : index
    %59 = vector.load %arg5[%c0_20, %c0_21] : memref<8x4xf32, #tpu.memory_space<vmem>>, vector<8x4xf32>
    tpu.vector_store %arg5[%c0_20, %c0_21], %58 {strides = array<i32>} : memref<8x4xf32, #tpu.memory_space<vmem>>, vector<8x4xf32>,
    return
  }
  func.func @transform_0(%arg0: i32) -> (i32, i32) {
    %c0_i32 = arith.constant 0 : i32
    %c0_i32_0 = arith.constant 0 : i32
    return %arg0, %c0_i32 : i32, i32
  }
  func.func @transform_1(%arg0: i32) -> (i32, i32) {
    %c0_i32 = arith.constant 0 : i32
    %c0_i32_0 = arith.constant 0 : i32
    return %arg0, %c0_i32 : i32, i32
  }
  func.func @transform_2(%arg0: i32) -> (i32, i32) {
    %c0_i32 = arith.constant 0 : i32
    %c0_i32_0 = arith.constant 0 : i32
    return %arg0, %c0_i32 : i32, i32
  }
  func.func @transform_3(%arg0: i32) -> (i32, i32) {
    %c0_i32 = arith.constant 0 : i32
    %c0_i32_0 = arith.constant 0 : i32
    return %arg0, %c0_i32 : i32, i32
  }
  func.func @transform_4(%arg0: i32) -> (i32, i32) {
    %c0_i32 = arith.constant 0 : i32
    %c0_i32_0 = arith.constant 0 : i32
    return %arg0, %c0_i32 : i32, i32
  }
}

</mosaic_0001>

<bundles_post_ra>
// kernel: _distmult_forward.1
= control target key start
LH: loop header
LB: loop body
LE: loop exit
PB: predicated region body
PF: predicated region fallthrough
CT: control target
= control target key end

     0   :  { %vm26_vm0 = vcmask 261120   ;;  %vm125_vm14 = vcmask 7168   ;;  %vm127_vm15 = vcmask 15360   ;;  %s204_s2 = inlined_call_operand.vmem [shape: bf16[8,32], index: 2, kind: input, shape index: {}]   ;;  %s205_s0 = inlined_call_operand.vmem [shape: bf16[8,32], index: 0, kind: input, shape index: {}]   ;;  %s206_s1 = inlined_call_operand.vmem [shape: bf16[8,32], index: 1, kind: input, shape index: {}]   ;;  %s207_s3 = inlined_call_operand.vmem [shape: bf16[8,32], index: 3, kind: input, shape index: {}]   ;;  %s208_s4 = inlined_call_operand.vmem [shape: f32[8,4], index: 4, kind: output, shape index: {}]  }
   0x1   :  { %v21_v0 = vld [vmem:[%s204_s2] sm:$0xf] }
   0x2   :  { %v17_v1 = vld [vmem:[%s205_s0] sm:$0xf]  ;;  %v22_v3 = vunpack.c.l.bf16 %v21_v0 }
   0x3   :  { %v19_v2 = vld [vmem:[%s206_s1] sm:$0xf]  ;;  %v18_v4 = vunpack.c.l.bf16 %v17_v1 }
   0x4   :  { %v20_v5 = vunpack.c.l.bf16 %v19_v2  ;;  %v23_v6 = vld [vmem:[%s207_s3] sm:$0xf]  ;;  %v41_v8 = vmul.f32 %v22_v3, %v22_v3 }
   0x5   :  { %v24_v7 = vunpack.c.l.bf16 %v23_v6  ;;  %v25_v20 = vmul.f32 %v18_v4, %v18_v4 }
   0x6   :  { %v73_v9 = vmul.f32 %v20_v5, %v18_v4  ;;  %v71_v10 = vmul.f32 %v22_v3, %v20_v5  ;;  %v42_v11 = vsel %vm26_vm0, %v41_v8, 0.0 }
   0x7   :  { %43 = vadd.xlane.f32.xlu1 %v42_v11  ;;  %v56_v16 = vmul.f32 %v24_v7, %v24_v7  ;;  %v27_v21 = vsel %vm26_vm0, %v25_v20, 0.0 }
   0x8   :  { %v74_v12 = vmul.f32 %v73_v9, %v24_v7  ;;  %v72_v13 = vmul.f32 %v71_v10, %v18_v4  ;;  %v75_v23 = vmul.f32 %v71_v10, %v24_v7 }
   0x9   :  { %v57_v19 = vsel %vm26_vm0, %v56_v16, 0.0 }
   0xa   :  { %v106_v14 = vmul.f32 %v74_v12, %v74_v12  ;;  %v82_v15 = vmul.f32 %v72_v13, %v72_v13  ;;  %v77_v22 = vsel %vm26_vm0, %v72_v13, 0.0  ;;  %v100_v24 = vsel %vm26_vm0, %v75_v23, 0.0 }
   0xc   :  { %v107_v17 = vsel %vm26_vm0, %v106_v14, 0.0  ;;  %v83_v18 = vsel %vm26_vm0, %v82_v15, 0.0  ;;  %vm129_vm0 = vcmask 23552  }
   0xd   :  { %108 = vadd.xlane.f32.xlu2 %v107_v17  ;;  %84 = vadd.xlane.f32.xlu0 %v83_v18 }
   0xf   :  { %58 = vadd.xlane.f32.xlu1 %v57_v19 }
  0x15   :  { %28 = vadd.xlane.f32.xlu0 %v27_v21  ;;  %78 = vadd.xlane.f32.xlu2 %v77_v22 }
  0x1d   :  { %101 = vadd.xlane.f32.xlu0 %v100_v24 }
  0x7a   :  { %v44_v25 = vpop.xlane.xlu1 %43 }
  0x7b   :  { %v45_v26 = vmax.f32 %v44_v25, 1e-24 }
  0x7d   :  { %137 = vrsqrt.f32 %v45_v26  ;;  %vm52_vm8 = vweird.f32 %v45_v26 }
  0x80   :  { %v191_v27 = vpop.xlane.xlu2 %108  ;;  %v85_v28 = vpop.xlane.xlu0 %84 }
  0x81   :  { %139 = vrsqrt.f32 %v191_v27  ;;  %vm93_vm2 = vcmp.eq.f32.partialorder %v85_v28, inf  ;;  %v96_v1 = vand.u32 2147483648, %v85_v28  ;;  %vm117_vm7 = vcmp.eq.f32.partialorder %v191_v27, inf }
  0x82   :  { %141 = vrsqrt.f32 %v85_v28  ;;  %v59_v29 = vpop.xlane.xlu1 %58  ;;  %vm95_vm9 = vcmp.eq.f32.partialorder %v85_v28, 0.0  ;;  %v120_v7 = vand.u32 2147483648, %v191_v27  ;;  %vm119_vm13 = vcmp.eq.f32.partialorder %v191_v27, 0.0 }
  0x83   :  { %v138_v30 = vpop.eup %137  ;;  %v60_v31 = vmax.f32 %v59_v29, 1e-24 }
  0x84   :  { %v47_v33 = vmul.f32 %v138_v30, %v45_v26  ;;  %vm53_vm3 = vweird.f32 %v138_v30 }
  0x85   :  { %143 = vrsqrt.f32 %v60_v31  ;;  %vm67_vm4 = vweird.f32 %v60_v31  ;;  %vm54_vm10 = vmor %vm52_vm8, %vm53_vm3 }
  0x86   :  { %v48_v40 = vmul.f32 %v138_v30, %v47_v33 }
  0x87   :  { %v140_v32 = vpop.eup %139 }
  0x88   :  { %v142_v34 = vpop.eup %141  ;;  %v111_v35 = vmul.f32 %v140_v32, %v191_v27  ;;  %v29_v36 = vpop.xlane.xlu0 %28  ;;  %v49_v47 = vmul.f32 0.5, %v48_v40 }
  0x89   :  { %v87_v37 = vmul.f32 %v142_v34, %v85_v28  ;;  %v30_v38 = vmax.f32 %v29_v36, 1e-24  ;;  %v79_v2 = vpop.xlane.xlu2 %78 }
  0x8a   :  { %v112_v39 = vmul.f32 %v140_v32, %v111_v35  ;;  %v50_v55 = vsub.f32 1.5, %v49_v47  ;;  %v80_v10 = vsub.f32 0.0, %v79_v2 }
  0x8b   :  { %v88_v41 = vmul.f32 %v142_v34, %v87_v37  ;;  %145 = vrsqrt.f32 %v30_v38  ;;  %v144_v43 = vpop.eup %143  ;;  %vm37_vm11 = vweird.f32 %v30_v38 }
  0x8c   :  { %v113_v42 = vmul.f32 0.5, %v112_v39  ;;  %v62_v46 = vmul.f32 %v144_v43, %v60_v31  ;;  %vm68_vm1 = vweird.f32 %v144_v43  ;;  %v51_v62 = vmul.f32 %v138_v30, %v50_v55 }
  0x8d   :  { %v89_v44 = vmul.f32 0.5, %v88_v41  ;;  %vm69_vm5 = vmor %vm67_vm4, %vm68_vm1  ;;  %vm131_vm1 = vcmask 31744  }
  0x8e   :  { %v114_v45 = vsub.f32 1.5, %v113_v42  ;;  %v63_v49 = vmul.f32 %v144_v43, %v62_v46  ;;  %v55_v9 = vsel %vm54_vm10, %v138_v30, %v51_v62 }
  0x8f   :  { %v90_v48 = vsub.f32 1.5, %v89_v44 }
  0x90   :  { %v115_v51 = vmul.f32 %v140_v32, %v114_v45  ;;  %v64_v53 = vmul.f32 0.5, %v63_v49  ;;  %v102_v4 = vpop.xlane.xlu0 %101 }
  0x91   :  { %v146_v50 = vpop.eup %145  ;;  %v91_v52 = vmul.f32 %v142_v34, %v90_v48  ;;  %v103_v12 = vsub.f32 0.0, %v102_v4 }
  0x92   :  { %v32_v54 = vmul.f32 %v146_v50, %v30_v38  ;;  %v65_v57 = vsub.f32 1.5, %v64_v53  ;;  %v116_v59 = vmul.f32 %v115_v51, %v191_v27  ;;  %vm38_vm6 = vweird.f32 %v146_v50 }
  0x93   :  { %v92_v56 = vmul.f32 %v91_v52, %v85_v28  ;;  %vm39_vm12 = vmor %vm37_vm11, %vm38_vm6 }
  0x94   :  { %v33_v58 = vmul.f32 %v146_v50, %v32_v54  ;;  %v66_v61 = vmul.f32 %v144_v43, %v65_v57  ;;  %v118_v5 = vsel %vm117_vm7, %v191_v27, %v116_v59 }
  0x95   :  { %v94_v63 = vsel %vm93_vm2, %v85_v28, %v92_v56  ;;  %v121_v13 = vsel %vm119_vm13, %v120_v7, %v118_v5 }
  0x96   :  { %v34_v60 = vmul.f32 0.5, %v33_v58  ;;  %v70_v3 = vsel %vm69_vm5, %v144_v43, %v66_v61  ;;  %v97_v6 = vsel %vm95_vm9, %v96_v1, %v94_v63  ;;  %v122_v18 = vsub.f32 0.0, %v121_v13 }
  0x97   :  { %v104_v11 = vmul.f32 %v70_v3, %v55_v9  ;;  %v98_v15 = vsub.f32 0.0, %v97_v6 }
  0x98   :  { %v35_v0 = vsub.f32 1.5, %v34_v60 }
  0x99   :  { %v105_v21 = vmul.f32 %v104_v11, %v103_v12 }
  0x9a   :  { %v36_v8 = vmul.f32 %v146_v50, %v35_v0 }
  0x9c   :  { %v40_v14 = vsel %vm39_vm12, %v146_v50, %v36_v8 }
  0x9d   :  { %v76_v16 = vmul.f32 %v55_v9, %v40_v14  ;;  %v123_v17 = vmul.f32 %v70_v3, %v40_v14 }
  0x9f   :  { %v81_v19 = vmul.f32 %v80_v10, %v76_v16  ;;  %v99_v20 = vmul.f32 %v98_v15, %v76_v16  ;;  %v124_v22 = vmul.f32 %v123_v17, %v122_v18 }
  0xa1   :  { %v126_v23 = vsel %vm125_vm14, %v81_v19, %v99_v20 }
  0xa2   :  { %v128_v24 = vsel %vm127_vm15, %v126_v23, %v105_v21 }
  0xa3   :  { %v130_v25 = vsel %vm129_vm0, %v128_v24, %v124_v22 }
  0xa4   :  { %132 = vst.msk [vmem:[%s208_s4] sm:$0xff] %vm131_vm1, %v130_v25 }

</bundles_post_ra>
